<compile_context>
chip_gen: v7x
topology: tpu7x:2x2x1
jax: 0.10.0
libtpu: 0.0.40
codegen_flags: <defaults>
</compile_context>

<pallas_src>
import jax
import jax.numpy as jnp
from jax.experimental import pallas as pl
from jax.experimental.pallas import tpu as pltpu


def _identity_kernel(x_ref, o_ref):
    # Pure element-wise copy of the current VMEM tile.
    o_ref[...] = x_ref[...]


def _round_up(n, m):
    return ((n + m - 1) // m) * m


def _round_down_at_least(n, m):
    return max(m, (n // m) * m)


def _tpu_params():
    """Per-generation VMEM budget / block targets (trace-time hardware query)."""
    vmem_cap = 128 << 20
    try:
        info = pltpu.get_tpu_info()
        vmem_cap = int(getattr(info, "vmem_capacity_bytes", vmem_cap))
    except Exception:
        pass
    if vmem_cap <= (64 << 20):
        # v7x-class: 64 MiB VMEM, 2 TensorCores/chip.
        return {
            "target_block": 4 << 20,       # padded bytes per block
            "single_block_cap": 8 << 20,   # whole array as one block if <= this
            "vmem_limit": 48 << 20,
            "min_steps": 4,                # >=2 steps per core -> DMA overlap
        }
    # v5e / v6e: 128 MiB VMEM, 1 TensorCore/chip.
    return {
        "target_block": 12 << 20,
        "single_block_cap": 12 << 20,
        "vmem_limit": 96 << 20,
        "min_steps": 1,                    # serial grid: never split small inputs
    }


def _lane_dense_2d(x):
    """Metadata-only reshape to (rows, cols) with cols a multiple of 128 if possible."""
    size = x.size
    cols = 1
    for d in reversed(x.shape):
        cols *= d
        if cols % 128 == 0:
            return x.reshape(size // cols, cols)
    if size % 128 == 0:
        return x.reshape(size // 128, 128)
    # Last resort: single row; masked partial stores are unavoidable here.
    return x.reshape(1, size)


def _identity_pallas(x: jax.Array) -> jax.Array:
    """y = x, copied tile-by-tile through VMEM with Pallas (no wrapper HBM copies)."""
    if x.size == 0:
        return x

    orig_shape = x.shape
    x2 = _lane_dense_2d(x)
    R, C = x2.shape

    itemsize = jnp.dtype(x.dtype).itemsize
    sub = 8 * max(1, 4 // itemsize)          # sublane granule: 8 f32, 16 bf16, 32 int8
    params = _tpu_params()
    target = params["target_block"]

    def padded_bytes(br, bc):
        return _round_up(br, sub) * _round_up(bc, 128) * itemsize

    total_padded = padded_bytes(R, C)

    if total_padded <= params["single_block_cap"]:
        # Whole array as one block: no per-step overhead, no forced split.
        br, bc = R, C
    elif padded_bytes(min(R, sub), C) <= target:
        # Tile rows only, full lane width per block.
        br = target // (_round_up(C, 128) * itemsize)
        br = min(R, _round_down_at_least(br, sub))
        ms = params["min_steps"]
        if ms > 1 and pl.cdiv(R, br) < ms and R > sub:
            # v7x: keep >= ms row-blocks so each TensorCore can double-buffer.
            br = min(br, _round_down_at_least(pl.cdiv(R, ms), sub))
        bc = C
    else:
        # Even a single sublane-height full-width row exceeds the block target:
        # real 2-D tiling with lane-aligned column blocks.
        br = min(R, sub)
        bc = target // (_round_up(br, sub) * itemsize)
        bc = _round_down_at_least(bc, 128)
        bc = min(bc, C)

    grid = (pl.cdiv(R, br), pl.cdiv(C, bc))
    spec = pl.BlockSpec((br, bc), lambda i, j: (i, j))

    out = pl.pallas_call(
        _identity_kernel,
        out_shape=jax.ShapeDtypeStruct((R, C), x.dtype),
        grid_spec=pltpu.PrefetchScalarGridSpec(
            num_scalar_prefetch=0,
            grid=grid,
            in_specs=[spec],
            out_specs=spec,
        ),
        cost_estimate=pl.CostEstimate(
            flops=0,
            transcendentals=0,
            bytes_accessed=2 * x.size * itemsize,
        ),
        compiler_params=pltpu.CompilerParams(
            dimension_semantics=("parallel", "parallel"),
            vmem_limit_bytes=params["vmem_limit"],
        ),
    )(x2)

    return out.reshape(orig_shape)


# Standard entry point (input kept alive by the caller): lane-dense Pallas copy.
base_model_forward = jax.jit(_identity_pallas)


def _donated_identity(x):
    # Identity with a donated buffer: the optimal "kernel" is no data movement
    # at all — the output simply reuses the input's HBM buffer.
    return x


base_model_forward_donated = jax.jit(_donated_identity, donate_argnums=(0,))


if __name__ == "__main__":
    key = jax.random.PRNGKey(0)
    # Small NCHW input consistent with a typical BaseModel subclass usage.
    x = jax.random.normal(key, (2, 4, 16, 16), dtype=jnp.float32)

    y = base_model_forward(x)
    jax.block_until_ready(y)

    # Identity semantics check (the only well-defined behavior of a base model).
    assert y.shape == x.shape and y.dtype == x.dtype
    assert bool(jnp.array_equal(y, x))

    # bf16 path: lane-dense flatten handles sub-32-bit dtypes with no special casing.
    xb = jax.random.normal(jax.random.PRNGKey(1), (2, 4, 16, 16), dtype=jnp.bfloat16)
    yb = base_model_forward(xb)
    jax.block_until_ready(yb)
    assert yb.dtype == xb.dtype and bool(jnp.array_equal(yb, xb))

    # Awkward shape (size not a multiple of 128) still runs (masked-store fallback).
    xo = jax.random.normal(jax.random.PRNGKey(2), (3, 5, 7), dtype=jnp.float32)
    yo = base_model_forward(xo)
    jax.block_until_ready(yo)
    assert bool(jnp.array_equal(yo, xo))

    # Donating path: zero-copy identity (do not reuse xd afterwards).
    xd = jnp.full((2, 4, 16, 16), 3.0, dtype=jnp.float32)
    yd = base_model_forward_donated(xd)
    jax.block_until_ready(yd)
    assert bool(jnp.all(yd == 3.0))

    print("KERNEL_OK")
</pallas_src>

<mosaic_0001>
module attributes {stable_mosaic.version = 11 : i64} {
  func.func @_identity_kernel(%arg0: i32, %arg1: i32, %arg2: memref<8x256xf32, #tpu.memory_space<vmem>>, %arg3: memref<8x256xf32, #tpu.memory_space<vmem>>) attributes {dimension_semantics = [#tpu.dimension_semantics<parallel>, #tpu.dimension_semantics<parallel>], iteration_bounds = array<i64: 1, 1>, scalar_prefetch = 0 : i64, scratch_operands = 0 : i64, tpu.core_type = #tpu.core_type<tc>, window_params = [{transform_indices = @transform_0, window_bounds = array<i64: 8, 256>}, {transform_indices = @transform_1, window_bounds = array<i64: 8, 256>}]} {
    %c0 = arith.constant 0 : index
    %c0_0 = arith.constant 0 : index
    %0 = vector.load %arg2[%c0, %c0_0] : memref<8x256xf32, #tpu.memory_space<vmem>>, vector<8x256xf32>
    %c0_1 = arith.constant 0 : index
    %c0_2 = arith.constant 0 : index
    %1 = vector.load %arg3[%c0_1, %c0_2] : memref<8x256xf32, #tpu.memory_space<vmem>>, vector<8x256xf32>
    tpu.vector_store %arg3[%c0_1, %c0_2], %0 {strides = array<i32>} : memref<8x256xf32, #tpu.memory_space<vmem>>, vector<8x256xf32>,
    return
  }
  func.func @transform_0(%arg0: i32, %arg1: i32) -> (i32, i32) {
    %c0_i32 = arith.constant 0 : i32
    return %arg0, %arg1 : i32, i32
  }
  func.func @transform_1(%arg0: i32, %arg1: i32) -> (i32, i32) {
    %c0_i32 = arith.constant 0 : i32
    return %arg0, %arg1 : i32, i32
  }
}

</mosaic_0001>

<bundles_post_ra>
// kernel: _identity_pallas.1
= control target key start
LH: loop header
LB: loop body
LE: loop exit
PB: predicated region body
PF: predicated region fallthrough
CT: control target
= control target key end

     0   :  { %6 = vsyncpa [#allocation3], 0  ;;  %s126_s0 = inlined_call_operand.hbm [shape: f32[8,256], index: 0, kind: input, shape index: {}]   ;;  %s127_s1 = inlined_call_operand.hbm [shape: f32[8,256], index: 1, kind: output, shape index: {}]  }
   0x1   :  { %7 = vsyncpa [#allocation4], 0  ;;  %s90_s6 = smov [#allocation2]   ;;  %s42_s10 = scalar_lea.hbm %s126_s0, 256 }
   0x2   :  { %s14_s7 = sshll.u32 %s90_s6, 4  ;;  %p43_p0 = scmp.ne.s32.totalorder %s126_s0, %s42_s10  ;;  %s15_s7 = int_to_ptr.vmem [resolvable:$true] %s14_s7 }
   0x3   :  { %p46_p1 = scmp.lt.u32.totalorder %s42_s10, %s126_s0 }
   0x5   :  { %p48_p2 = pnand %p46_p1, %p43_p0 }
   0x7   :  { %51 = shalt.err (!%p48_p2)
}
   0x8   :  { %s52_s15 = scalar_lea.vmem %s15_s7, 256  ;;  %p57_p4 = scmp.lt.s32.totalorder %s15_s7, %s15_s7 }
   0x9   :  { %p53_p3 = scmp.ne.s32.totalorder %s15_s7, %s52_s15  ;;  %p58_p5 = scmp.lt.s32.totalorder %s52_s15, %s52_s15 }
   0xb   :  { %p59_p6 = por %p58_p5, %p57_p4 }
   0xd   :  { %p60_p7 = pnand %p59_p6, %p53_p3 }
   0xf   :  { %63 = shalt.err (!%p60_p7)
}
  0x10   :  { %17 = dma.hbm_to_vmem [thread:$0]  %s126_s0, 256, %s15_s7, [#allocation3]  }
  0x11   :  { %86 = dma.done.wait [#allocation3], 256  }
  0x12   :  { %87 = vsyncadd [#allocation3], 4294967040  ;;  %s91_s18 = smov [#allocation5]   ;;  %v21_v0 = vld [vmem:[#allocation2] sm:$0xff]  ;;  %v22_v1 = vld [vmem:[#allocation2 + $0x8] sm:$0xff] }
  0x13   :  { %s31_s19 = sshll.u32 %s91_s18, 4  ;;  %23 = vst [vmem:[#allocation5] sm:$0xff] %v21_v0  ;;  %24 = vst [vmem:[#allocation5 + $0x8] sm:$0xff] %v22_v1  ;;  %s32_s19 = int_to_ptr.vmem [resolvable:$true] %s31_s19 }
  0x14   :  { %s64_s20 = scalar_lea.vmem %s32_s19, 256  ;;  %p69_p9 = scmp.lt.s32.totalorder %s32_s19, %s32_s19 }
  0x15   :  { %p65_p8 = scmp.ne.s32.totalorder %s32_s19, %s64_s20  ;;  %p70_p10 = scmp.lt.s32.totalorder %s64_s20, %s64_s20 }
  0x17   :  { %p71_p11 = por %p70_p10, %p69_p9 }
  0x19   :  { %p72_p12 = pnand %p71_p11, %p65_p8 }
  0x1b   :  { %75 = shalt.err (!%p72_p12)
}
  0x1c   :  { %s76_s0 = scalar_lea.hbm %s127_s1, 256 }
  0x1d   :  { %p77_p13 = scmp.ne.s32.totalorder %s127_s1, %s76_s0  ;;  %p80_p0 = scmp.lt.u32.totalorder %s76_s0, %s127_s1 }
  0x1f   :  { %p82_p1 = pnand %p80_p0, %p77_p13 }
  0x21   :  { %85 = shalt.err (!%p82_p1)
}
  0x22   :  { %34 = dma.vmem_to_hbm [thread:$0]  %s32_s19, 256, %s127_s1, [#allocation4]  }
  0x23   :  { %88 = dma.done.wait [#allocation4], 256  }
  0x24   :  { %89 = vsyncadd [#allocation4], 4294967040 }
  0x25   :  { %38 = vsyncpa [#allocation3], 1 }
  0x26   :  { %39 = vsyncpa [#allocation4], 1 }

</bundles_post_ra>
